<compile_context>
chip_gen: v7x
topology: tpu7x:2x2x1
jax: 0.10.0
libtpu: 0.0.40
codegen_flags: <defaults>
</compile_context>

<pallas_src>
import functools

import jax
import jax.numpy as jnp
from jax import lax
from jax.experimental import pallas as pl
from jax.experimental.pallas import tpu as pltpu

BN_EPS = 1e-5


def _round_up(x, m):
    return (x + m - 1) // m * m


def _pick_row_tile(ohw, desired):
    """Pick a row tile that divides OH*OW (so tiles never straddle samples).

    Returns OH*OW itself (always legal: block dim == array dim) unless the
    caller asked for something smaller AND an 8-aligned divisor exists.
    """
    desired = max(8, int(desired))
    if desired >= ohw:
        return ohw
    for d in range(desired, 7, -1):
        if ohw % d == 0 and d % 8 == 0:
            return d
    return ohw


def _make_kernel(tile_r, m_true, ohw):
    inv_m = 1.0 / float(m_true)
    inv_tile = 1.0 / float(tile_r)
    inv_ohw = 1.0 / float(ohw)

    def kernel(patches_ref, wc_ref, gamma_ref, beta_ref, wf_ref, bf_ref,
               out_ref,
               refmean_ref, sum_ref, sumsq_ref, scale_ref, shift_ref,
               pooled_ref):
        phase = pl.program_id(0)          # 0 = BN batch stats, 1 = apply/pool/FC
        s = pl.program_id(1)              # sample index
        r = pl.program_id(2)              # row-tile index inside the sample
        last_s = pl.num_programs(1) - 1
        last_r = pl.num_programs(2) - 1
        first_step = (s == 0) & (r == 0)
        last_step = (s == last_s) & (r == last_r)

        # Conv tile as an MXU matmul: bf16 operands, f32 accumulation.
        # Conv bias intentionally omitted: it cancels exactly under
        # training-mode BatchNorm (subtracted back out with the batch mean).
        conv = jnp.dot(patches_ref[0], wc_ref[...],
                       preferred_element_type=jnp.float32)

        # ---------------- phase 0: BN batch statistics ----------------
        @pl.when((phase == 0) & first_step)
        def _init_stats():
            # Per-channel reference mean from the first tile -> centered sums
            # stay numerically small (no E[x^2]-E[x]^2 cancellation).
            refmean_ref[...] = jnp.sum(conv, axis=0, keepdims=True) * inv_tile
            sum_ref[...] = jnp.zeros_like(sum_ref)
            sumsq_ref[...] = jnp.zeros_like(sumsq_ref)

        @pl.when(phase == 0)
        def _accum_stats():
            d = conv - refmean_ref[...]
            sum_ref[...] += jnp.sum(d, axis=0, keepdims=True)
            sumsq_ref[...] += jnp.sum(d * d, axis=0, keepdims=True)

        @pl.when((phase == 0) & last_step)
        def _finalize_stats():
            dmean = sum_ref[...] * inv_m
            var = jnp.maximum(sumsq_ref[...] * inv_m - dmean * dmean, 0.0)
            scale = gamma_ref[...] * lax.rsqrt(var + BN_EPS)
            scale_ref[...] = scale
            shift_ref[...] = beta_ref[...] - (refmean_ref[...] + dmean) * scale

        # ---------- phase 1: fused BN + ReLU + per-sample pooling + FC --------
        @pl.when((phase == 1) & first_step)
        def _init_pool():
            pooled_ref[...] = jnp.zeros_like(pooled_ref)

        @pl.when(phase == 1)
        def _apply_and_pool():
            y = jnp.maximum(conv * scale_ref[...] + shift_ref[...], 0.0)
            # Tile belongs to exactly one sample -> plain sublane sum.
            pooled_ref[pl.ds(s, 1), :] += jnp.sum(y, axis=0, keepdims=True)

        @pl.when((phase == 1) & last_step)
        def _finalize():
            pooled = pooled_ref[...] * inv_ohw            # per-sample avg pool
            out_ref[...] = (jnp.dot(pooled, wf_ref[...],
                                    preferred_element_type=jnp.float32)
                            + bf_ref[...])

    return kernel


def im2col_nhw(x, kh, kw, stride, pad):
    """x: [N, C, H, W] -> patches [N, OH*OW, C*kh*kw] (torch Conv2d ordering)."""
    n, c, h, w = x.shape
    oh = (h + 2 * pad - kh) // stride + 1
    ow = (w + 2 * pad - kw) // stride + 1
    xp = jnp.pad(x, ((0, 0), (0, 0), (pad, pad), (pad, pad)))
    cols = []
    for i in range(kh):
        for j in range(kw):
            cols.append(xp[:, :, i:i + stride * oh:stride,
                           j:j + stride * ow:stride])            # [N, C, OH, OW]
    p = jnp.stack(cols, axis=2)                                  # [N, C, kh*kw, OH, OW]
    p = jnp.transpose(p, (0, 3, 4, 1, 2))                        # [N, OH, OW, C, kh*kw]
    return p.reshape(n, oh * ow, c * kh * kw), oh, ow


@functools.partial(jax.jit, static_argnames=("tile_m",))
def resnet50_forward(x, params, *, tile_m=8192):
    """x: [N, 3, H, W] float32 (NCHW, like PyTorch). Returns [N, num_classes]."""
    wc = params["conv_w"]          # [64, 3, 7, 7]
    gamma = params["bn_gamma"]     # [64]
    beta = params["bn_beta"]       # [64]
    wf = params["fc_w"]            # [num_classes, 64]
    bf = params["fc_b"]            # [num_classes]
    # params["conv_b"] is deliberately unused by the kernel: the conv bias
    # cancels exactly under training-mode BatchNorm.

    n = x.shape[0]
    c_out = wc.shape[0]
    num_classes = wf.shape[0]

    # bf16 BEFORE im2col: dominant HBM stream is half-width, built in one shot,
    # K kept at its true 147 columns (no zero padding streamed from HBM).
    patches, oh, ow = im2col_nhw(x.astype(jnp.bfloat16), 7, 7, stride=2, pad=3)
    _, ohw, k = patches.shape                                    # ohw = oh*ow
    m_true = n * ohw

    tile_r = _pick_row_tile(ohw, tile_m)
    n_r = ohw // tile_r

    # MXU-/lane-friendly padding of the small resident operands only.
    c_pad = _round_up(max(c_out, 128), 128)
    nc_pad = _round_up(max(num_classes, 128), 128)
    n_pad = _round_up(max(n, 8), 8)

    wc_mat = jnp.zeros((k, c_pad), jnp.bfloat16).at[:, :c_out].set(
        wc.reshape(c_out, -1).T.astype(jnp.bfloat16))
    gamma_row = jnp.zeros((1, c_pad), jnp.float32).at[:, :c_out].set(
        gamma.reshape(1, -1))
    beta_row = jnp.zeros((1, c_pad), jnp.float32).at[:, :c_out].set(
        beta.reshape(1, -1))
    wf_mat = jnp.zeros((c_pad, nc_pad), jnp.float32).at[:c_out, :num_classes].set(wf.T)
    bf_row = jnp.zeros((1, nc_pad), jnp.float32).at[:, :num_classes].set(
        bf.reshape(1, -1))

    kernel = _make_kernel(tile_r, m_true, ohw)

    out = pl.pallas_call(
        kernel,
        out_shape=jax.ShapeDtypeStruct((n_pad, nc_pad), jnp.float32),
        grid_spec=pltpu.PrefetchScalarGridSpec(
            num_scalar_prefetch=0,
            grid=(2, n, n_r),                         # (phase, sample, row tile)
            in_specs=[
                # patches: last dim 147 == full array dim (legal, no lane pad);
                # tile_r either divides OH*OW with 8-alignment or == OH*OW.
                pl.BlockSpec((1, tile_r, k), lambda p, s, r: (s, r, 0)),
                pl.BlockSpec((k, c_pad), lambda p, s, r: (0, 0)),      # conv W
                pl.BlockSpec((1, c_pad), lambda p, s, r: (0, 0)),      # gamma
                pl.BlockSpec((1, c_pad), lambda p, s, r: (0, 0)),      # beta
                pl.BlockSpec((c_pad, nc_pad), lambda p, s, r: (0, 0)), # fc W
                pl.BlockSpec((1, nc_pad), lambda p, s, r: (0, 0)),     # fc b
            ],
            out_specs=pl.BlockSpec((n_pad, nc_pad), lambda p, s, r: (0, 0)),
            scratch_shapes=[
                pltpu.VMEM((1, c_pad), jnp.float32),      # reference mean (shift)
                pltpu.VMEM((1, c_pad), jnp.float32),      # centered channel sum
                pltpu.VMEM((1, c_pad), jnp.float32),      # centered channel sumsq
                pltpu.VMEM((1, c_pad), jnp.float32),      # fused BN scale
                pltpu.VMEM((1, c_pad), jnp.float32),      # fused BN shift
                pltpu.VMEM((n_pad, c_pad), jnp.float32),  # per-sample pooled sums
            ]),
        compiler_params=pltpu.CompilerParams(
            # Scratch accumulators + phase0 -> phase1 scale/shift handoff need
            # strictly sequential grid execution: keep every axis "arbitrary".
            dimension_semantics=("arbitrary", "arbitrary", "arbitrary"),
            # Large-tile budget; stays under v7x's 64 MiB physical VMEM.
            vmem_limit_bytes=48 * 1024 * 1024),
    )(patches, wc_mat, gamma_row, beta_row, wf_mat, bf_row)

    return out[:n, :num_classes]


def reference_forward(x, params):
    """Pure-JAX reference matching PyTorch semantics (training-mode BN)."""
    conv = lax.conv_general_dilated(
        x, params["conv_w"], window_strides=(2, 2),
        padding=((3, 3), (3, 3)),
        dimension_numbers=("NCHW", "OIHW", "NCHW"))
    conv = conv + params["conv_b"][None, :, None, None]
    mean = jnp.mean(conv, axis=(0, 2, 3), keepdims=True)
    var = jnp.mean(jnp.square(conv - mean), axis=(0, 2, 3), keepdims=True)
    y = (conv - mean) * lax.rsqrt(var + BN_EPS)
    y = y * params["bn_gamma"][None, :, None, None] + params["bn_beta"][None, :, None, None]
    y = jnp.maximum(y, 0.0)
    pooled = jnp.mean(y, axis=(2, 3))
    return pooled @ params["fc_w"].T + params["fc_b"]


def init_params(key, num_classes=7):
    k1, k2, k3, k4 = jax.random.split(key, 4)
    return {
        "conv_w": jax.random.normal(k1, (64, 3, 7, 7), jnp.float32) * 0.05,
        "conv_b": jax.random.normal(k2, (64,), jnp.float32) * 0.05,
        "bn_gamma": jnp.ones((64,), jnp.float32),
        "bn_beta": jnp.zeros((64,), jnp.float32),
        "fc_w": jax.random.normal(k3, (num_classes, 64), jnp.float32) * 0.05,
        "fc_b": jax.random.normal(k4, (num_classes,), jnp.float32) * 0.05,
    }


if __name__ == "__main__":
    key = jax.random.PRNGKey(0)
    kx, kp = jax.random.split(key)
    # Small input consistent with the module (conv expects 3 input channels).
    x = jax.random.normal(kx, (2, 3, 16, 16), jnp.float32)   # -> OH=OW=8, ohw=64
    params = init_params(kp, num_classes=7)

    ref = reference_forward(x, params)

    # tile_m=32 forces tile_r=32 < ohw: grid (2, 2, 2) exercises the multi-tile
    # BN reduction across both the sample and row-tile axes plus pooled accum.
    out_small = jax.block_until_ready(resnet50_forward(x, params, tile_m=32))
    # Default large-tile path: one whole sample per tile, grid (2, 2, 1).
    out = jax.block_until_ready(resnet50_forward(x, params))

    ref = jax.block_until_ready(ref)
    assert out.shape == (2, 7) and out_small.shape == (2, 7)
    err = max(float(jnp.max(jnp.abs(out - ref))),
              float(jnp.max(jnp.abs(out_small - ref))))
    assert err < 2e-2, f"mismatch vs reference: {err}"
    print("KERNEL_OK")
</pallas_src>

<mosaic_0001>
module attributes {stable_mosaic.version = 11 : i64} {
  func.func @kernel(%arg0: i32, %arg1: i32, %arg2: i32, %arg3: memref<1x32x147xbf16, #tpu.memory_space<vmem>>, %arg4: memref<147x128xbf16, #tpu.memory_space<vmem>>, %arg5: memref<1x128xf32, #tpu.memory_space<vmem>>, %arg6: memref<1x128xf32, #tpu.memory_space<vmem>>, %arg7: memref<128x128xf32, #tpu.memory_space<vmem>>, %arg8: memref<1x128xf32, #tpu.memory_space<vmem>>, %arg9: memref<8x128xf32, #tpu.memory_space<vmem>>, %arg10: memref<1x128xf32, #tpu.memory_space<vmem>>, %arg11: memref<1x128xf32, #tpu.memory_space<vmem>>, %arg12: memref<1x128xf32, #tpu.memory_space<vmem>>, %arg13: memref<1x128xf32, #tpu.memory_space<vmem>>, %arg14: memref<1x128xf32, #tpu.memory_space<vmem>>, %arg15: memref<8x128xf32, #tpu.memory_space<vmem>>) attributes {dimension_semantics = [#tpu.dimension_semantics<arbitrary>, #tpu.dimension_semantics<arbitrary>, #tpu.dimension_semantics<arbitrary>], iteration_bounds = array<i64: 2, 2, 2>, scalar_prefetch = 0 : i64, scratch_operands = 6 : i64, tpu.core_type = #tpu.core_type<tc>, window_params = [{transform_indices = @transform_0, window_bounds = array<i64: 1, 32, 147>}, {pipeline_mode = #tpu.pipeline_mode<synchronous>, transform_indices = @transform_1, window_bounds = array<i64: 147, 128>}, {pipeline_mode = #tpu.pipeline_mode<synchronous>, transform_indices = @transform_2, window_bounds = array<i64: 1, 128>}, {pipeline_mode = #tpu.pipeline_mode<synchronous>, transform_indices = @transform_3, window_bounds = array<i64: 1, 128>}, {pipeline_mode = #tpu.pipeline_mode<synchronous>, transform_indices = @transform_4, window_bounds = array<i64: 128, 128>}, {pipeline_mode = #tpu.pipeline_mode<synchronous>, transform_indices = @transform_5, window_bounds = array<i64: 1, 128>}, {pipeline_mode = #tpu.pipeline_mode<synchronous>, transform_indices = @transform_6, window_bounds = array<i64: 8, 128>}]} {
    %c0_i32 = arith.constant 0 : i32
    %0 = arith.cmpi eq, %arg1, %c0_i32 : i32
    %c0_i32_0 = arith.constant 0 : i32
    %1 = arith.cmpi eq, %arg2, %c0_i32_0 : i32
    %2 = arith.andi %0, %1 : i1
    %c1_i32 = arith.constant 1 : i32
    %3 = arith.cmpi eq, %arg1, %c1_i32 : i32
    %c1_i32_1 = arith.constant 1 : i32
    %4 = arith.cmpi eq, %arg2, %c1_i32_1 : i32
    %5 = arith.andi %3, %4 : i1
    %c0 = arith.constant 0 : index
    %c0_2 = arith.constant 0 : index
    %c0_3 = arith.constant 0 : index
    %6 = vector.load %arg3[%c0, %c0_2, %c0_3] : memref<1x32x147xbf16, #tpu.memory_space<vmem>>, vector<1x32x147xbf16>
    %7 = vector.shape_cast %6 : vector<1x32x147xbf16> to vector<32x147xbf16>
    %c0_4 = arith.constant 0 : index
    %c0_5 = arith.constant 0 : index
    %8 = vector.load %arg4[%c0_4, %c0_5] : memref<147x128xbf16, #tpu.memory_space<vmem>>, vector<147x128xbf16>
    %cst = arith.constant dense<0.000000e+00> : vector<32x128xf32>
    %9 = tpu.matmul %7, %8, %cst {dimension_numbers = #tpu.dot_dimension_numbers<[1], [0], [0], [1], [0, 0, 1, 1], [], []>} : vector<32x147xbf16>, vector<147x128xbf16>, vector<32x128xf32> -> vector<32x128xf32>
    %c0_i32_6 = arith.constant 0 : i32
    %10 = arith.cmpi eq, %arg0, %c0_i32_6 : i32
    %11 = arith.andi %10, %2 : i1
    %12 = arith.extui %11 : i1 to i32
    %c0_i32_7 = arith.constant 0 : i32
    %13 = arith.cmpi ne, %12, %c0_i32_7 : i32
    scf.if %13 {
      %cst_18 = arith.constant dense<0.000000e+00> : vector<128xf32>
      %32 = vector.multi_reduction <add>, %9, %cst_18 [0] : vector<32x128xf32> to vector<128xf32>
      %33 = vector.shape_cast %32 : vector<128xf32> to vector<1x128xf32>
      %cst_19 = arith.constant 3.125000e-02 : f32
      %34 = vector.broadcast %cst_19 : f32 to vector<1x128xf32>
      %35 = arith.mulf %33, %34 : vector<1x128xf32>
      %c0_20 = arith.constant 0 : index
      %c0_21 = arith.constant 0 : index
      %36 = vector.load %arg10[%c0_20, %c0_21] : memref<1x128xf32, #tpu.memory_space<vmem>>, vector<1x128xf32>
      tpu.vector_store %arg10[%c0_20, %c0_21], %35 {strides = array<i32>} : memref<1x128xf32, #tpu.memory_space<vmem>>, vector<1x128xf32>,
      %cst_22 = arith.constant 0.000000e+00 : f32
      %37 = vector.broadcast %cst_22 : f32 to vector<1x128xf32>
      %c0_23 = arith.constant 0 : index
      %c0_24 = arith.constant 0 : index
      %38 = vector.load %arg11[%c0_23, %c0_24] : memref<1x128xf32, #tpu.memory_space<vmem>>, vector<1x128xf32>
      tpu.vector_store %arg11[%c0_23, %c0_24], %37 {strides = array<i32>} : memref<1x128xf32, #tpu.memory_space<vmem>>, vector<1x128xf32>,
      %cst_25 = arith.constant 0.000000e+00 : f32
      %39 = vector.broadcast %cst_25 : f32 to vector<1x128xf32>
      %c0_26 = arith.constant 0 : index
      %c0_27 = arith.constant 0 : index
      %40 = vector.load %arg12[%c0_26, %c0_27] : memref<1x128xf32, #tpu.memory_space<vmem>>, vector<1x128xf32>
      tpu.vector_store %arg12[%c0_26, %c0_27], %39 {strides = array<i32>} : memref<1x128xf32, #tpu.memory_space<vmem>>, vector<1x128xf32>,
    } else {
    }
    %c0_i32_8 = arith.constant 0 : i32
    %14 = arith.cmpi eq, %arg0, %c0_i32_8 : i32
    %15 = arith.extui %14 : i1 to i32
    %c0_i32_9 = arith.constant 0 : i32
    %16 = arith.cmpi ne, %15, %c0_i32_9 : i32
    scf.if %16 {
      %c0_18 = arith.constant 0 : index
      %c0_19 = arith.constant 0 : index
      %32 = vector.load %arg10[%c0_18, %c0_19] : memref<1x128xf32, #tpu.memory_space<vmem>>, vector<1x128xf32>
      %33 = vector.broadcast %32 : vector<1x128xf32> to vector<32x128xf32>
      %34 = arith.subf %9, %33 : vector<32x128xf32>
      %c0_20 = arith.constant 0 : index
      %c0_21 = arith.constant 0 : index
      %35 = vector.load %arg11[%c0_20, %c0_21] : memref<1x128xf32, #tpu.memory_space<vmem>>, vector<1x128xf32>
      %cst_22 = arith.constant dense<0.000000e+00> : vector<128xf32>
      %36 = vector.multi_reduction <add>, %34, %cst_22 [0] : vector<32x128xf32> to vector<128xf32>
      %37 = vector.shape_cast %36 : vector<128xf32> to vector<1x128xf32>
      %38 = arith.addf %35, %37 : vector<1x128xf32>
      %c0_23 = arith.constant 0 : index
      %c0_24 = arith.constant 0 : index
      %39 = vector.load %arg11[%c0_23, %c0_24] : memref<1x128xf32, #tpu.memory_space<vmem>>, vector<1x128xf32>
      tpu.vector_store %arg11[%c0_23, %c0_24], %38 {strides = array<i32>} : memref<1x128xf32, #tpu.memory_space<vmem>>, vector<1x128xf32>,
      %c0_25 = arith.constant 0 : index
      %c0_26 = arith.constant 0 : index
      %40 = vector.load %arg12[%c0_25, %c0_26] : memref<1x128xf32, #tpu.memory_space<vmem>>, vector<1x128xf32>
      %41 = arith.mulf %34, %34 : vector<32x128xf32>
      %cst_27 = arith.constant dense<0.000000e+00> : vector<128xf32>
      %42 = vector.multi_reduction <add>, %41, %cst_27 [0] : vector<32x128xf32> to vector<128xf32>
      %43 = vector.shape_cast %42 : vector<128xf32> to vector<1x128xf32>
      %44 = arith.addf %40, %43 : vector<1x128xf32>
      %c0_28 = arith.constant 0 : index
      %c0_29 = arith.constant 0 : index
      %45 = vector.load %arg12[%c0_28, %c0_29] : memref<1x128xf32, #tpu.memory_space<vmem>>, vector<1x128xf32>
      tpu.vector_store %arg12[%c0_28, %c0_29], %44 {strides = array<i32>} : memref<1x128xf32, #tpu.memory_space<vmem>>, vector<1x128xf32>,
    } else {
    }
    %c0_i32_10 = arith.constant 0 : i32
    %17 = arith.cmpi eq, %arg0, %c0_i32_10 : i32
    %18 = arith.andi %17, %5 : i1
    %19 = arith.extui %18 : i1 to i32
    %c0_i32_11 = arith.constant 0 : i32
    %20 = arith.cmpi ne, %19, %c0_i32_11 : i32
    scf.if %20 {
      %c0_18 = arith.constant 0 : index
      %c0_19 = arith.constant 0 : index
      %32 = vector.load %arg11[%c0_18, %c0_19] : memref<1x128xf32, #tpu.memory_space<vmem>>, vector<1x128xf32>
      %cst_20 = arith.constant 7.812500e-03 : f32
      %33 = vector.broadcast %cst_20 : f32 to vector<1x128xf32>
      %34 = arith.mulf %32, %33 : vector<1x128xf32>
      %c0_21 = arith.constant 0 : index
      %c0_22 = arith.constant 0 : index
      %35 = vector.load %arg12[%c0_21, %c0_22] : memref<1x128xf32, #tpu.memory_space<vmem>>, vector<1x128xf32>
      %cst_23 = arith.constant 7.812500e-03 : f32
      %36 = vector.broadcast %cst_23 : f32 to vector<1x128xf32>
      %37 = arith.mulf %35, %36 : vector<1x128xf32>
      %38 = arith.mulf %34, %34 : vector<1x128xf32>
      %39 = arith.subf %37, %38 : vector<1x128xf32>
      %cst_24 = arith.constant 0.000000e+00 : f32
      %40 = vector.broadcast %cst_24 : f32 to vector<1x128xf32>
      %41 = arith.maximumf %39, %40 : vector<1x128xf32>
      %c0_25 = arith.constant 0 : index
      %c0_26 = arith.constant 0 : index
      %42 = vector.load %arg5[%c0_25, %c0_26] : memref<1x128xf32, #tpu.memory_space<vmem>>, vector<1x128xf32>
      %cst_27 = arith.constant 9.99999974E-6 : f32
      %43 = vector.broadcast %cst_27 : f32 to vector<1x128xf32>
      %44 = arith.addf %41, %43 : vector<1x128xf32>
      %45 = math.rsqrt %44 : vector<1x128xf32>
      %46 = arith.mulf %42, %45 : vector<1x128xf32>
      %c0_28 = arith.constant 0 : index
      %c0_29 = arith.constant 0 : index
      %47 = vector.load %arg13[%c0_28, %c0_29] : memref<1x128xf32, #tpu.memory_space<vmem>>, vector<1x128xf32>
      tpu.vector_store %arg13[%c0_28, %c0_29], %46 {strides = array<i32>} : memref<1x128xf32, #tpu.memory_space<vmem>>, vector<1x128xf32>,
      %c0_30 = arith.constant 0 : index
      %c0_31 = arith.constant 0 : index
      %48 = vector.load %arg6[%c0_30, %c0_31] : memref<1x128xf32, #tpu.memory_space<vmem>>, vector<1x128xf32>
      %c0_32 = arith.constant 0 : index
      %c0_33 = arith.constant 0 : index
      %49 = vector.load %arg10[%c0_32, %c0_33] : memref<1x128xf32, #tpu.memory_space<vmem>>, vector<1x128xf32>
      %50 = arith.addf %49, %34 : vector<1x128xf32>
      %51 = arith.mulf %50, %46 : vector<1x128xf32>
      %52 = arith.subf %48, %51 : vector<1x128xf32>
      %c0_34 = arith.constant 0 : index
      %c0_35 = arith.constant 0 : index
      %53 = vector.load %arg14[%c0_34, %c0_35] : memref<1x128xf32, #tpu.memory_space<vmem>>, vector<1x128xf32>
      tpu.vector_store %arg14[%c0_34, %c0_35], %52 {strides = array<i32>} : memref<1x128xf32, #tpu.memory_space<vmem>>, vector<1x128xf32>,
    } else {
    }
    %c1_i32_12 = arith.constant 1 : i32
    %21 = arith.cmpi eq, %arg0, %c1_i32_12 : i32
    %22 = arith.andi %21, %2 : i1
    %23 = arith.extui %22 : i1 to i32
    %c0_i32_13 = arith.constant 0 : i32
    %24 = arith.cmpi ne, %23, %c0_i32_13 : i32
    scf.if %24 {
      %cst_18 = arith.constant 0.000000e+00 : f32
      %32 = vector.broadcast %cst_18 : f32 to vector<8x128xf32>
      %c0_19 = arith.constant 0 : index
      %c0_20 = arith.constant 0 : index
      %33 = vector.load %arg15[%c0_19, %c0_20] : memref<8x128xf32, #tpu.memory_space<vmem>>, vector<8x128xf32>
      tpu.vector_store %arg15[%c0_19, %c0_20], %32 {strides = array<i32>} : memref<8x128xf32, #tpu.memory_space<vmem>>, vector<8x128xf32>,
    } else {
    }
    %c1_i32_14 = arith.constant 1 : i32
    %25 = arith.cmpi eq, %arg0, %c1_i32_14 : i32
    %26 = arith.extui %25 : i1 to i32
    %c0_i32_15 = arith.constant 0 : i32
    %27 = arith.cmpi ne, %26, %c0_i32_15 : i32
    scf.if %27 {
      %c0_18 = arith.constant 0 : index
      %c0_19 = arith.constant 0 : index
      %32 = vector.load %arg13[%c0_18, %c0_19] : memref<1x128xf32, #tpu.memory_space<vmem>>, vector<1x128xf32>
      %33 = vector.broadcast %32 : vector<1x128xf32> to vector<32x128xf32>
      %34 = arith.mulf %9, %33 : vector<32x128xf32>
      %c0_20 = arith.constant 0 : index
      %c0_21 = arith.constant 0 : index
      %35 = vector.load %arg14[%c0_20, %c0_21] : memref<1x128xf32, #tpu.memory_space<vmem>>, vector<1x128xf32>
      %36 = vector.broadcast %35 : vector<1x128xf32> to vector<32x128xf32>
      %37 = arith.addf %34, %36 : vector<32x128xf32>
      %cst_22 = arith.constant 0.000000e+00 : f32
      %38 = vector.broadcast %cst_22 : f32 to vector<32x128xf32>
      %39 = arith.maximumf %37, %38 : vector<32x128xf32>
      %40 = arith.index_cast %arg1 : i32 to index
      %c0_23 = arith.constant 0 : index
      %41 = vector.load %arg15[%40, %c0_23] : memref<8x128xf32, #tpu.memory_space<vmem>>, vector<1x128xf32>
      %cst_24 = arith.constant dense<0.000000e+00> : vector<128xf32>
      %42 = vector.multi_reduction <add>, %39, %cst_24 [0] : vector<32x128xf32> to vector<128xf32>
      %43 = vector.shape_cast %42 : vector<128xf32> to vector<1x128xf32>
      %44 = arith.addf %41, %43 : vector<1x128xf32>
      %45 = arith.index_cast %arg1 : i32 to index
      %c0_25 = arith.constant 0 : index
      %46 = vector.load %arg15[%45, %c0_25] : memref<8x128xf32, #tpu.memory_space<vmem>>, vector<1x128xf32>
      tpu.vector_store %arg15[%45, %c0_25], %44 {strides = array<i32>} : memref<8x128xf32, #tpu.memory_space<vmem>>, vector<1x128xf32>,
    } else {
    }
    %c1_i32_16 = arith.constant 1 : i32
    %28 = arith.cmpi eq, %arg0, %c1_i32_16 : i32
    %29 = arith.andi %28, %5 : i1
    %30 = arith.extui %29 : i1 to i32
    %c0_i32_17 = arith.constant 0 : i32
    %31 = arith.cmpi ne, %30, %c0_i32_17 : i32
    scf.if %31 {
      %c0_18 = arith.constant 0 : index
      %c0_19 = arith.constant 0 : index
      %32 = vector.load %arg15[%c0_18, %c0_19] : memref<8x128xf32, #tpu.memory_space<vmem>>, vector<8x128xf32>
      %cst_20 = arith.constant 1.562500e-02 : f32
      %33 = vector.broadcast %cst_20 : f32 to vector<8x128xf32>
      %34 = arith.mulf %32, %33 : vector<8x128xf32>
      %c0_21 = arith.constant 0 : index
      %c0_22 = arith.constant 0 : index
      %35 = vector.load %arg7[%c0_21, %c0_22] : memref<128x128xf32, #tpu.memory_space<vmem>>, vector<128x128xf32>
      %cst_23 = arith.constant dense<0.000000e+00> : vector<8x128xf32>
      %36 = tpu.matmul %34, %35, %cst_23 {dimension_numbers = #tpu.dot_dimension_numbers<[1], [0], [0], [1], [0, 0, 1, 1], [], []>} : vector<8x128xf32>, vector<128x128xf32>, vector<8x128xf32> -> vector<8x128xf32>
      %c0_24 = arith.constant 0 : index
      %c0_25 = arith.constant 0 : index
      %37 = vector.load %arg8[%c0_24, %c0_25] : memref<1x128xf32, #tpu.memory_space<vmem>>, vector<1x128xf32>
      %38 = vector.broadcast %37 : vector<1x128xf32> to vector<8x128xf32>
      %39 = arith.addf %36, %38 : vector<8x128xf32>
      %c0_26 = arith.constant 0 : index
      %c0_27 = arith.constant 0 : index
      %40 = vector.load %arg9[%c0_26, %c0_27] : memref<8x128xf32, #tpu.memory_space<vmem>>, vector<8x128xf32>
      tpu.vector_store %arg9[%c0_26, %c0_27], %39 {strides = array<i32>} : memref<8x128xf32, #tpu.memory_space<vmem>>, vector<8x128xf32>,
    } else {
    }
    return
  }
  func.func @transform_0(%arg0: i32, %arg1: i32, %arg2: i32) -> (i32, i32, i32) {
    %c0_i32 = arith.constant 0 : i32
    %c0_i32_0 = arith.constant 0 : i32
    return %arg1, %arg2, %c0_i32 : i32, i32, i32
  }
  func.func @transform_1(%arg0: i32, %arg1: i32, %arg2: i32) -> (i32, i32) {
    %c0_i32 = arith.constant 0 : i32
    %c0_i32_0 = arith.constant 0 : i32
    %c0_i32_1 = arith.constant 0 : i32
    return %c0_i32, %c0_i32_0 : i32, i32
  }
  func.func @transform_2(%arg0: i32, %arg1: i32, %arg2: i32) -> (i32, i32) {
    %c0_i32 = arith.constant 0 : i32
    %c0_i32_0 = arith.constant 0 : i32
    %c0_i32_1 = arith.constant 0 : i32
    return %c0_i32, %c0_i32_0 : i32, i32
  }
  func.func @transform_3(%arg0: i32, %arg1: i32, %arg2: i32) -> (i32, i32) {
    %c0_i32 = arith.constant 0 : i32
    %c0_i32_0 = arith.constant 0 : i32
    %c0_i32_1 = arith.constant 0 : i32
    return %c0_i32, %c0_i32_0 : i32, i32
  }
  func.func @transform_4(%arg0: i32, %arg1: i32, %arg2: i32) -> (i32, i32) {
    %c0_i32 = arith.constant 0 : i32
    %c0_i32_0 = arith.constant 0 : i32
    %c0_i32_1 = arith.constant 0 : i32
    return %c0_i32, %c0_i32_0 : i32, i32
  }
  func.func @transform_5(%arg0: i32, %arg1: i32, %arg2: i32) -> (i32, i32) {
    %c0_i32 = arith.constant 0 : i32
    %c0_i32_0 = arith.constant 0 : i32
    %c0_i32_1 = arith.constant 0 : i32
    return %c0_i32, %c0_i32_0 : i32, i32
  }
  func.func @transform_6(%arg0: i32, %arg1: i32, %arg2: i32) -> (i32, i32) {
    %c0_i32 = arith.constant 0 : i32
    %c0_i32_0 = arith.constant 0 : i32
    %c0_i32_1 = arith.constant 0 : i32
    return %c0_i32, %c0_i32_0 : i32, i32
  }
}

</mosaic_0001>

<bundles_post_ra>
// kernel: resnet50_forward.1
= control target key start
LH: loop header
LB: loop body
LE: loop exit
PB: predicated region body
PF: predicated region fallthrough
CT: control target
= control target key end

     0   :  { %s1037_s21 = smov 0   ;;  %s1039_s22 = smov 0   ;;  %s1289_s0 = inlined_call_operand.vmem [shape: bf16[2,64,147], index: 0, kind: input, shape index: {}]   ;;  %s1290_s1 = inlined_call_operand.vmem [shape: bf16[147,128], index: 1, kind: input, shape index: {}]   ;;  %s1291_s2 = inlined_call_operand.vmem [shape: f32[1,128], index: 2, kind: input, shape index: {}]   ;;  %s1292_s3 = inlined_call_operand.vmem [shape: f32[1,128], index: 3, kind: input, shape index: {}]   ;;  %s1293_s4 = inlined_call_operand.vmem [shape: f32[128,128], index: 4, kind: input, shape index: {}]   ;;  %s1294_s5 = inlined_call_operand.vmem [shape: f32[1,128], index: 5, kind: input, shape index: {}]   ;;  %s1295_s6 = inlined_call_operand.vmem [shape: f32[8,128], index: 6, kind: output, shape index: {}]  }
   0x1   :  { %s1041_s23 = smov 0   ;;  %s1043_s24 = smov 0  }
   0x2   :  { %s1045_s25 = smov 0   ;;  %s1047_s26 = smov 0  }
   0x3   :  { %s1049_s27 = smov 0  }
   0x4 LB: > { %s28_s28 = sadd.s32 1, %s981_s24  ;;  %s31_s29 = sadd.s32 1, %s985_s25  ;;  %s993_s27 = sphi %s1049_s27, %s16_s27   ;;  %s989_s26 = sphi %s1047_s26, %s1303_s26   ;;  %s985_s25 = sphi %s1045_s25, %s1302_s25   ;;  %s981_s24 = sphi %s1043_s24, %s1301_s24   ;;  %s977_s23 = sphi %s1041_s23, %s1300_s23   ;;  %s973_s22 = sphi %s1039_s22, %s1299_s22   ;;  %s969_s21 = sphi %s1037_s21, %s1298_s21  }
   0x5   : > { %p29_p0 = scmp.ge.s32.totalorder %s28_s28, 2  ;;  %p733_p1 = scmp.ge.s32.totalorder %s993_s27, 1 }
   0x6   : > { %p234_p2 = scmp.lt.s32.totalorder %s993_s27, 9  ;;  %s35_s30 = sadd.s32 1, %s989_s26 }
   0x7   : > { %s1305_s28 = smov (%p29_p0, %s28_s28), 0  ;;  %s1307_s29 = smov (!%p29_p0, %s31_s29), %s985_s25 }
   0x8   : > { %p235_p3 = pnand %p733_p1, %p234_p2  ;;  %p33_p4 = scmp.ge.s32.totalorder %s1307_s29, 2 }
   0x9   : > { %v921_v0 = vld [vmem:[%s1290_s1] sm:$0xff] (!%p235_p3)   ;;  %p280_p6 = scmp.eq.s32.totalorder (!%p235_p3), %s973_s22, 1  ;;  %p281_p7 = scmp.eq.s32.totalorder (!%p235_p3), %s969_s21, 1  ;;  %v995_v1 = vmov (!%p235_p3), 0   ;;  %v922_v2 = vld [vmem:[%s1290_s1 + $0x8] sm:$0xff] (!%p235_p3)   ;;  %v923_v3 = vld [vmem:[%s1290_s1 + $0x10] sm:$0xff] (!%p235_p3)  }
   0xa   : > { %s1309_s29 = smov (%p33_p4, %s1307_s29), 0  ;;  %s1311_s30 = smov (!%p33_p4, %s35_s30), %s989_s26 }
   0xb   : > { %p37_p5 = scmp.ge.s32.totalorder %s1311_s30, 2  ;;  %238 = sbr.rel (%p235_p3) target bundleno = 641 (0x281), region = 44  ;;  %396 = vmatprep.subr.bf16.mxu0 (!%p235_p3), %v995_v1  ;;  %838 = vmatprep.subr.bf16.mxu1 (!%p235_p3), %v995_v1  ;;  %v924_v4 = vld [vmem:[%s1290_s1 + $0x18] sm:$0xff] (!%p235_p3)   ;;  %v925_v5 = vld [vmem:[%s1290_s1 + $0x20] sm:$0xff] (!%p235_p3)   ;;  %v926_v6 = vld [vmem:[%s1290_s1 + $0x28] sm:$0xff] (!%p235_p3)   ;;  %vm382_vm0 = vcmask (!%p235_p3), 154624  }
   0xc   : > { %397 = vmatpush1.bf16.msra.mxu0 (!%p235_p3), %v921_v0  ;;  %848 = vmatpush1.bf16.msra.mxu1 (!%p235_p3), %v921_v0  ;;  %p1095_p8 = pnand (!%p235_p3), %p281_p7, %p280_p6  ;;  %s734_s14 = sshll.u32 (!%p235_p3), %s969_s21, 2  ;;  %v927_v9 = vld [vmem:[%s1290_s1 + $0x30] sm:$0xff] (!%p235_p3)   ;;  %vm389_vm1 = vcmask (!%p235_p3), 1040384   ;;  %v928_v10 = vld [vmem:[%s1290_s1 + $0x38] sm:$0xff] (!%p235_p3)   ;;  %vm390_vm2 = vcmask (!%p235_p3), 1041408   ;;  %v996_v11 = vmov (!%p235_p3), 65535  }
   0xd   : > { %s1313_s30 = smov (%p37_p5, %s1311_s30), 0  ;;  %398 = vmatprep.subr.bf16.mxu0 (!%p235_p3), %v995_v1  ;;  %839 = vmatprep.subr.bf16.mxu1 (!%p235_p3), %v995_v1  ;;  %p265_p10 = scmp.lt.s32.totalorder (!%p235_p3), %s973_s22, 1  ;;  %v391_v12 = vsel (!%p235_p3), %vm389_vm1, 4294967295, %v996_v11  ;;  %v929_v13 = vld [vmem:[%s1290_s1 + $0x40] sm:$0xff] (!%p235_p3)  }
   0xe   : > { %p283_p9 = pneg (!%p235_p3), %p1095_p8  ;;  %p267_p11 = scmp.lt.s32.totalorder (!%p235_p3), %s734_s14, 7  ;;  %v930_v14 = vld [vmem:[%s1290_s1 + $0x48] ss:$0 sps:$4 sm:$0x33] (!%p235_p3)   ;;  %v392_v15 = vsel (!%p235_p3), %vm390_vm2, %v391_v12, 0 }
   0xf   : > { %v394_v16 = vand.u32 (!%p235_p3), %v930_v14, %v392_v15  ;;  %p276_p12 = scmp.eq.s32.totalorder (!%p235_p3), %s973_s22, 0  ;;  %p277_p13 = scmp.eq.s32.totalorder (!%p235_p3), %s969_s21, 0 }
  0x10   : > { %399 = vmatpush1.bf16.msra.mxu0 (!%p235_p3), %v922_v2  ;;  %849 = vmatpush1.bf16.msra.mxu1 (!%p235_p3), %v922_v2  ;;  %p445_p2 = scmp.eq.s32.totalorder (!%p235_p3), %s977_s23, 0 }
  0x11   : > { %400 = vmatprep.subr.bf16.mxu0 (!%p235_p3), %v995_v1  ;;  %840 = vmatprep.subr.bf16.mxu1 (!%p235_p3), %v995_v1  ;;  %p1157_p0 = pnand (!%p235_p3), %p277_p13, %p276_p12 }
  0x12   : > { %s266_s17 = scalar_select %p265_p10, %s973_s22, 1 }
  0x13   : > { %s1315_s14 = smov (!%p267_p11, %s734_s14), 7  ;;  %p279_p1 = pneg %p1157_p0 }
  0x14   : > { %401 = vmatpush1.bf16.msra.mxu0 %v923_v3  ;;  %850 = vmatpush1.bf16.msra.mxu1 %v923_v3  ;;  %s736_s18 = sshll.u32 %s266_s17, 4  ;;  %s735_s19 = sshll.u32 %s1315_s14, 1 }
  0x15   : > { %402 = vmatprep.subr.bf16.mxu0 %v995_v1  ;;  %841 = vmatprep.subr.bf16.mxu1 %v995_v1  ;;  %s271_s8 = sadd.s32 %s736_s18, %s735_s19  ;;  %p446_p3 = pnand %p445_p2, %p279_p1 }
  0x16   : > { %s737_s9 = sshll.u32 %s271_s8, 2  ;;  %v997_v28 = vmov (!%p446_p3), 0.0  }
  0x17   : > { %s1124_s13 = scalar_lea.vmem %s1289_s0, %s737_s9  ;;  %461 = vst [vmem:[#allocation3] sm:$0x1] (!%p446_p3), %v997_v28  ;;  %462 = vst [vmem:[#allocation4] sm:$0x1] (!%p446_p3), %v997_v28 }
  0x18   : > { %403 = vmatpush1.bf16.msra.mxu0 %v924_v4  ;;  %851 = vmatpush1.bf16.msra.mxu1 %v924_v4  ;;  %v933_v7 = vld [vmem:[%s1124_s13 + $0x4] ss:$8 sps:$4 sm:$0xff]   ;;  %v936_v8 = vld [vmem:[%s1124_s13 + $0x14] ss:$8 sps:$4 sm:$0xff]   ;;  %v931_v17 = vld [vmem:[%s1124_s13] ss:$8 sps:$4 sm:$0xff]  }
  0x19   : > { %404 = vmatprep.subr.bf16.mxu0 %v995_v1  ;;  %842 = vmatprep.subr.bf16.mxu1 %v995_v1  ;;  %v934_v18 = vld [vmem:[%s1124_s13 + $0x10] ss:$8 sps:$4 sm:$0xff]  }
  0x1a   : > { %752 = vmatprep.mubr.msk.bf16.mxu0 %vm382_vm0, %v933_v7  ;;  %753 = vmatprep.mubr.msk.bf16.mxu1 %vm382_vm0, %v936_v8 }
  0x1c   : > { %405 = vmatpush1.bf16.msra.mxu0 %v925_v5  ;;  %852 = vmatpush1.bf16.msra.mxu1 %v925_v5 }
  0x1d   : > { %406 = vmatprep.subr.bf16.mxu0 %v995_v1  ;;  %843 = vmatprep.subr.bf16.mxu1 %v995_v1 }
  0x20   : > { %407 = vmatpush1.bf16.msra.mxu0 %v926_v6  ;;  %853 = vmatpush1.bf16.msra.mxu1 %v926_v6 }
  0x21   : > { %408 = vmatprep.subr.bf16.mxu0 %v995_v1  ;;  %844 = vmatprep.subr.bf16.mxu1 %v995_v1 }
  0x24   : > { %409 = vmatpush1.bf16.msra.mxu0 %v927_v9  ;;  %854 = vmatpush1.bf16.msra.mxu1 %v927_v9 }
  0x25   : > { %410 = vmatprep.subr.bf16.mxu0 %v995_v1  ;;  %845 = vmatprep.subr.bf16.mxu1 %v995_v1 }
  0x28   : > { %411 = vmatpush1.bf16.msra.mxu0 %v928_v10  ;;  %855 = vmatpush1.bf16.msra.mxu1 %v928_v10 }
  0x29   : > { %412 = vmatprep.subr.bf16.mxu0 %v995_v1  ;;  %846 = vmatprep.subr.bf16.mxu1 %v995_v1 }
  0x2c   : > { %413 = vmatpush1.bf16.msra.mxu0 %v929_v13  ;;  %856 = vmatpush1.bf16.msra.mxu1 %v929_v13 }
  0x2d   : > { %414 = vmatprep.subr.bf16.mxu0 %v995_v1  ;;  %847 = vmatprep.subr.bf16.mxu1 %v995_v1 }
  0x30   : > { %415 = vmatpush1.bf16.msra.mxu0 %v394_v16  ;;  %857 = vmatpush1.bf16.msra.mxu1 %v394_v16 }
  0x33   : > { %429 = vmatmul.mubr.bf16.vlgmr.msra.gmra.mrb[0].mxu0 %v931_v17  ;;  %437 = vmatmul.mubr.bf16.vlgmr.msra.gmra.mrb[0].mxu1 %v934_v18 }
 0x103   : > { %449 = sbr.rel (%p446_p3) target bundleno = 286 (0x11e), region = 48 }
 0x106   : > { %v1169_v19 = vpop.f32.mrb[0].mxu0  ;;  %v1171_v20 = vpop.f32.mrb[0].mxu1 }
 0x107   : > { %v432_v21 = vpop.f32.mrb[1].mxu0  ;;  %v440_v22 = vpop.f32.mrb[1].mxu1 }
 0x108   : > { %v1173_v23 = vpop.f32.mrb[2].mxu0  ;;  %v1175_v24 = vpop.f32.mrb[2].mxu1 }
 0x109   : > { %v435_v25 = vpop.f32.mrb[3].mxu0  ;;  %v443_v26 = vpop.f32.mrb[3].mxu1  ;;  %v450_v27 = vadd.f32 (!%p446_p3), %v1173_v23, %v1169_v19 }
 0x10b   : > { %v451_v29 = vadd.f32 %v450_v27, %v1171_v20 }
 0x10d   : > { %v452_v30 = vadd.f32 %v451_v29, %v1175_v24 }
 0x10f   : > { %v453_v31 = vrot.slane %v452_v30, 4 }
 0x111   : > { %v454_v32 = vadd.f32 %v453_v31, %v452_v30 }
 0x113   : > { %v455_v33 = vrot.slane %v454_v32, 2 }
 0x115   : > { %v456_v34 = vadd.f32 %v455_v33, %v454_v32 }
 0x117   : > { %v457_v35 = vrot.slane %v456_v34, 1 }
 0x119   : > { %v458_v36 = vadd.f32 %v457_v35, %v456_v34 }
 0x11b   : > { %v459_v37 = vmul.f32 0.03125, %v458_v36 }
 0x11d   : > { %460 = vst [vmem:[#allocation2] sm:$0x1] %v459_v37 }
 0x11e PF: > { %p754_p4 = scmp.ne.s32.totalorder %s977_s23, 0 }
 0x11f   : > { %v477_v62 = vld [vmem:[#allocation3] sm:$0x1] (!%p754_p4)  ;;  %v489_v1 = vld [vmem:[#allocation4] sm:$0x1] (!%p754_p4) }
 0x120   : > { %465 = sbr.rel (%p754_p4) target bundleno = 318 (0x13e), region = 52 }
 0x124   : > { %v755_v38 = vld [vmem:[#allocation2] ss:$0 sm:$0xff] (!%p754_p4) }
 0x125   : > { %v473_v39 = vsub.f32 (!%p754_p4), %v1169_v19, %v755_v38  ;;  %v474_v40 = vsub.f32 (!%p754_p4), %v1173_v23, %v755_v38  ;;  %v475_v41 = vsub.f32 (!%p754_p4), %v1171_v20, %v755_v38  ;;  %v476_v42 = vsub.f32 (!%p754_p4), %v1175_v24, %v755_v38 }
 0x127   : > { %v478_v43 = vadd.f32 %v474_v40, %v473_v39  ;;  %v490_v44 = vmul.f32 %v473_v39, %v473_v39  ;;  %v491_v45 = vmul.f32 %v474_v40, %v474_v40  ;;  %v492_v46 = vmul.f32 %v475_v41, %v475_v41 }
 0x128   : > { %v493_v48 = vmul.f32 %v476_v42, %v476_v42 }
 0x129   : > { %v479_v47 = vadd.f32 %v478_v43, %v475_v41  ;;  %v494_v49 = vadd.f32 %v491_v45, %v490_v44 }
 0x12b   : > { %v480_v50 = vadd.f32 %v479_v47, %v476_v42  ;;  %v495_v51 = vadd.f32 %v494_v49, %v492_v46 }
 0x12d   : > { %v481_v52 = vrot.slane %v480_v50, 4  ;;  %v496_v53 = vadd.f32 %v495_v51, %v493_v48 }
 0x12f   : > { %v482_v54 = vadd.f32 %v481_v52, %v480_v50  ;;  %v497_v55 = vrot.slane %v496_v53, 4 }
 0x131   : > { %v483_v56 = vrot.slane %v482_v54, 2  ;;  %v498_v57 = vadd.f32 %v497_v55, %v496_v53 }
 0x133   : > { %v484_v58 = vadd.f32 %v483_v56, %v482_v54  ;;  %v499_v59 = vrot.slane %v498_v57, 2 }
 0x135   : > { %v485_v60 = vrot.slane %v484_v58, 1  ;;  %v500_v61 = vadd.f32 %v499_v59, %v498_v57 }
 0x137   : > { %v486_v63 = vadd.f32 %v485_v60, %v484_v58  ;;  %v501_v0 = vrot.slane %v500_v61, 1 }
 0x139   : > { %v487_v2 = vadd.f32 %v486_v63, %v477_v62  ;;  %v502_v3 = vadd.f32 %v501_v0, %v500_v61 }
 0x13b   : > { %488 = vst [vmem:[#allocation3] sm:$0x1] %v487_v2  ;;  %v503_v4 = vadd.f32 %v502_v3, %v489_v1 }
 0x13d   : > { %504 = vst [vmem:[#allocation4] sm:$0x1] %v503_v4 }
 0x13e PF: > { %p505_p5 = pnand %p445_p2, %p283_p9 }
 0x13f   : > { %v522_v13 = vld [vmem:[#allocation2] sm:$0x1] (!%p505_p5) }
 0x140   : > { %508 = sbr.rel (%p505_p5) target bundleno = 351 (0x15f), region = 56  ;;  %v516_v14 = vld [vmem:[%s1291_s2] sm:$0x1] (!%p505_p5) }
 0x141   : > { %v521_v18 = vld [vmem:[%s1292_s3] sm:$0x1] (!%p505_p5) }
 0x142   : > { %v509_v5 = vld [vmem:[#allocation3] sm:$0x1] (!%p505_p5) }
 0x143   : > { %v510_v7 = vmul.f32 (!%p505_p5), 0.0078125, %v509_v5 }
 0x144   : > { %v511_v6 = vld [vmem:[#allocation4] sm:$0x1] (!%p505_p5) }
 0x145   : > { %v512_v8 = vmul.f32 (!%p505_p5), 0.0078125, %v511_v6  ;;  %v513_v9 = vmul.f32 (!%p505_p5), %v510_v7, %v510_v7  ;;  %v523_v15 = vadd.f32 (!%p505_p5), %v522_v13, %v510_v7 }
 0x147   : > { %v514_v10 = vsub.f32 %v512_v8, %v513_v9 }
 0x149   : > { %v515_v11 = vmax.f32 %v514_v10, 0.0 }
 0x14b   : > { %v517_v12 = vadd.f32 1e-05, %v515_v11 }
 0x14d   : > { %937 = vrsqrt.f32 %v517_v12 }
 0x157   : > { %v938_v16 = vpop.eup %937 }
 0x158   : > { %v519_v17 = vmul.f32 %v938_v16, %v516_v14 }
 0x15a   : > { %520 = vst [vmem:[#allocation5] sm:$0x1] %v519_v17  ;;  %v524_v21 = vmul.f32 %v523_v15, %v519_v17 }
 0x15c   : > { %v525_v22 = vsub.f32 %v521_v18, %v524_v21 }
 0x15e   : > { %526 = vst [vmem:[#allocation6] sm:$0x1] %v525_v22 }
 0x15f PF: > { %p527_p6 = scmp.eq.s32.totalorder %s977_s23, 1 }
 0x161   : > { %p528_p7 = pnand %p527_p6, %p279_p1 }
 0x162   : > { %v998_v25 = vmov (!%p528_p7), 0.0  }
 0x163   : > { %531 = sbr.rel (%p528_p7) target bundleno = 362 (0x16a), region = 60  ;;  %532 = vst [vmem:[#allocation7] sm:$0xff] (!%p528_p7), %v998_v25 }
 0x16a PF: > { %p756_p10 = scmp.ne.s32.totalorder %s977_s23, 1 }
 0x16b   : > { %v757_v26 = vld [vmem:[#allocation5] ss:$0 sm:$0xff] (!%p756_p10)  ;;  %v758_v27 = vld [vmem:[#allocation6] ss:$0 sm:$0xff] (!%p756_p10)  ;;  %s562_s16 = scalar_lea.vmem (!%p756_p10), [#allocation7], %s973_s22 }
 0x16c   : > { %535 = sbr.rel (%p756_p10) target bundleno = 391 (0x187), region = 64  ;;  %v543_v28 = vmul.f32 (!%p756_p10), %v757_v26, %v1169_v19  ;;  %v544_v29 = vmul.f32 (!%p756_p10), %v757_v26, %v1173_v23  ;;  %v545_v30 = vmul.f32 (!%p756_p10), %v757_v26, %v1171_v20  ;;  %v546_v31 = vmul.f32 (!%p756_p10), %v757_v26, %v1175_v24  ;;  %v563_v20 = vld [vmem:[%s562_s16] sm:$0x1] (!%p756_p10) }
 0x16e   : > { %v554_v32 = vadd.f32 (!%p756_p10), %v758_v27, %v543_v28  ;;  %v555_v33 = vadd.f32 (!%p756_p10), %v758_v27, %v544_v29  ;;  %v556_v34 = vadd.f32 (!%p756_p10), %v758_v27, %v545_v30  ;;  %v557_v35 = vadd.f32 (!%p756_p10), %v758_v27, %v546_v31 }
 0x170   : > { %v558_v36 = vmax.f32 (!%p756_p10), %v554_v32, 0.0  ;;  %v559_v37 = vmax.f32 (!%p756_p10), %v555_v33, 0.0  ;;  %v560_v38 = vmax.f32 (!%p756_p10), %v556_v34, 0.0  ;;  %v561_v39 = vmax.f32 (!%p756_p10), %v557_v35, 0.0 }
 0x172   : > { %v564_v40 = vadd.f32 (!%p756_p10), %v559_v37, %v558_v36 }
 0x174   : > { %v565_v41 = vadd.f32 %v564_v40, %v560_v38 }
 0x176   : > { %v566_v42 = vadd.f32 %v565_v41, %v561_v39 }
 0x178   : > { %v567_v43 = vrot.slane %v566_v42, 4 }
 0x17a   : > { %v568_v19 = vadd.f32 %v567_v43, %v566_v42 }
 0x17c   : > { %v569_v44 = vrot.slane %v568_v19, 2 }
 0x17e   : > { %v570_v23 = vadd.f32 %v569_v44, %v568_v19 }
 0x180   : > { %v571_v45 = vrot.slane %v570_v23, 1 }
 0x182   : > { %v572_v24 = vadd.f32 %v571_v45, %v570_v23 }
 0x184   : > { %v573_v46 = vadd.f32 %v572_v24, %v563_v20 }
 0x186   : > { %574 = vst [vmem:[%s562_s16] sm:$0x1] %v573_v46 }
 0x187 PF: > { %p575_p11 = pnand %p527_p6, %p283_p9 }
 0x188   : > { %v581_v47 = vld [vmem:[%s1293_s4] sm:$0xff] (!%p575_p11)  ;;  %v582_v48 = vld [vmem:[%s1293_s4 + $0x8] sm:$0xff] (!%p575_p11)  ;;  %v583_v49 = vld [vmem:[%s1293_s4 + $0x10] sm:$0xff] (!%p575_p11)  ;;  %v999_v50 = vmov (!%p575_p11), 0.0|0.0   ;;  %vm1000_vm3 = vmmov (!%p575_p11), 0   ;;  %v1001_v53 = vmov (!%p575_p11), 0.0  }
 0x189   : > { %578 = sbr.rel (%p575_p11) target bundleno = 641 (0x281), region = 68  ;;  %814 = vmatprep.subr.bf16.mxu0 (!%p575_p11), %v999_v50  ;;  %v815_v51 = vpack.c.bf16 (!%p575_p11), %v582_v48, %v581_v47  ;;  %v584_v52 = vld [vmem:[%s1293_s4 + $0x18] sm:$0xff] (!%p575_p11)  ;;  %811 = vmatprep.mubr.msk.f32.mxu0 (!%p575_p11), %vm1000_vm3, %v1001_v53  ;;  %v585_v55 = vld [vmem:[%s1293_s4 + $0x20] sm:$0xff] (!%p575_p11)  ;;  %v586_v56 = vld [vmem:[%s1293_s4 + $0x28] sm:$0xff] (!%p575_p11) }
 0x18a   : > { %v818_v54 = vpack.c.bf16 (!%p575_p11), %v584_v52, %v583_v49  ;;  %v821_v57 = vpack.c.bf16 (!%p575_p11), %v586_v56, %v585_v55  ;;  %v587_v58 = vld [vmem:[%s1293_s4 + $0x30] sm:$0xff] (!%p575_p11)  ;;  %v588_v59 = vld [vmem:[%s1293_s4 + $0x38] sm:$0xff] (!%p575_p11)  ;;  %v589_v61 = vld [vmem:[%s1293_s4 + $0x40] sm:$0xff] (!%p575_p11) }
 0x18b   : > { %816 = vmatpush3.bf16.msra.mxu0 (!%p575_p11), %v815_v51  ;;  %v824_v60 = vpack.c.bf16 (!%p575_p11), %v588_v59, %v587_v58  ;;  %v590_v62 = vld [vmem:[%s1293_s4 + $0x48] sm:$0xff] (!%p575_p11)  ;;  %v591_v0 = vld [vmem:[%s1293_s4 + $0x50] sm:$0xff] (!%p575_p11)  ;;  %v592_v1 = vld [vmem:[%s1293_s4 + $0x58] sm:$0xff] (!%p575_p11) }
 0x18c   : > { %817 = vmatprep.subr.bf16.mxu0 (!%p575_p11), %v999_v50  ;;  %v827_v63 = vpack.c.bf16 (!%p575_p11), %v590_v62, %v589_v61  ;;  %v830_v2 = vpack.c.bf16 (!%p575_p11), %v592_v1, %v591_v0  ;;  %v593_v3 = vld [vmem:[%s1293_s4 + $0x60] sm:$0xff] (!%p575_p11)  ;;  %v594_v4 = vld [vmem:[%s1293_s4 + $0x68] sm:$0xff] (!%p575_p11)  ;;  %v595_v6 = vld [vmem:[%s1293_s4 + $0x70] sm:$0xff] (!%p575_p11) }
 0x18d   : > { %v833_v5 = vpack.c.bf16 (!%p575_p11), %v594_v4, %v593_v3  ;;  %v596_v7 = vld [vmem:[%s1293_s4 + $0x78] sm:$0xff] (!%p575_p11)  ;;  %v579_v9 = vld [vmem:[#allocation7] sm:$0xff] (!%p575_p11)  ;;  %v759_v11 = vld [vmem:[%s1294_s5] ss:$0 sm:$0xff] (!%p575_p11) }
 0x18e   : > { %v836_v8 = vpack.c.bf16 (!%p575_p11), %v596_v7, %v595_v6  ;;  %v580_v10 = vmul.f32 (!%p575_p11), 0.015625, %v579_v9 }
 0x18f   : > { %819 = vmatpush3.bf16.msra.mxu0 (!%p575_p11), %v818_v54 }
 0x190   : > { %820 = vmatprep.subr.bf16.mxu0 %v999_v50 }
 0x193   : > { %822 = vmatpush3.bf16.msra.mxu0 %v821_v57 }
 0x194   : > { %823 = vmatprep.subr.bf16.mxu0 %v999_v50 }
 0x197   : > { %825 = vmatpush3.bf16.msra.mxu0 %v824_v60 }
 0x198   : > { %826 = vmatprep.subr.bf16.mxu0 %v999_v50 }
 0x19b   : > { %828 = vmatpush3.bf16.msra.mxu0 %v827_v63 }
 0x19c   : > { %829 = vmatprep.subr.bf16.mxu0 %v999_v50 }
 0x19f   : > { %831 = vmatpush3.bf16.msra.mxu0 %v830_v2 }
 0x1a0   : > { %832 = vmatprep.subr.bf16.mxu0 %v999_v50 }
 0x1a3   : > { %834 = vmatpush3.bf16.msra.mxu0 %v833_v5 }
 0x1a4   : > { %835 = vmatprep.subr.bf16.mxu0 %v999_v50 }
 0x1a7   : > { %837 = vmatpush3.bf16.msra.mxu0 %v836_v8 }
 0x1aa   : > { %812 = vmatmul.mubr.f32.vlgmr.msra.gmra.mrb[0].mxu0 %v580_v10 }
 0x27d   : > { %v670_v12 = vpop.f32.mrb[0].mxu0 }
 0x27e   : > { %v671_v13 = vadd.f32 %v759_v11, %v670_v12  ;;  %v813_v14 = vpop.f32.mrb[1].mxu0 }
 0x280   : > { %674 = vst [vmem:[%s1295_s6] sm:$0xff] %v671_v13 }
 0x281 PF: > { %s16_s27 = sadd.s32 1, %s993_s27   ;;  %s1298_s21 = smov %s981_s24 }
 0x282   : > { %p13_p8 = scmp.ge.s32.totalorder %s16_s27, 10   ;;  %s1299_s22 = smov %s985_s25 }
 0x283   : > { %s1300_s23 = smov %s989_s26  ;;  %s1301_s24 = smov %s1305_s28 }
 0x284   : > { %s1302_s25 = smov %s1309_s29  ;;  %s1303_s26 = smov %s1313_s30 }
 0x285   :  { %15 = sbr.rel (!%p13_p8) target bundleno = 4 (0x4), region = 95 }

</bundles_post_ra>
